<compile_context>
chip_gen: v7x
topology: tpu7x:2x2x1
jax: 0.10.0
libtpu: 0.0.40
codegen_flags: <defaults>
</compile_context>

<pallas_src>
import math

import jax
import jax.numpy as jnp
from jax.experimental import pallas as pl
from jax.experimental.pallas import tpu as pltpu


# ---------------------------------------------------------------------------
# Kernel: single HBM -> HBM DMA of the parameter into the output buffer.
# forward() == return self.position_embeddings, so this is a pure copy with
# no compute and no VMEM staging.
# ---------------------------------------------------------------------------
def _symbol_encoding_kernel(pe_hbm, o_hbm, sem):
    cp = pltpu.make_async_copy(pe_hbm, o_hbm, sem)
    cp.start()
    cp.wait()


# ---------------------------------------------------------------------------
# Wrapper
# ---------------------------------------------------------------------------
def symbol_encoding_forward(position_embeddings):
    """Returns position_embeddings (shape (1, d_model, num_contexts, f_len))."""
    shape = position_embeddings.shape
    dtype = position_embeddings.dtype
    nbytes = int(math.prod(shape)) * jnp.dtype(dtype).itemsize

    return pl.pallas_call(
        _symbol_encoding_kernel,
        out_shape=jax.ShapeDtypeStruct(shape, dtype),
        # Raw HBM refs on both sides -> the kernel drives one HBM->HBM DMA.
        in_specs=[pl.BlockSpec(memory_space=pl.ANY)],
        out_specs=pl.BlockSpec(memory_space=pl.ANY),
        scratch_shapes=[pltpu.SemaphoreType.DMA(())],
        cost_estimate=pl.CostEstimate(
            flops=0, transcendentals=0, bytes_accessed=2 * nbytes),
    )(position_embeddings)


# ---------------------------------------------------------------------------
# Deterministic parameter construction (matches nn.init.xavier_uniform_ on a
# 4-D tensor: fan_in = d_model * num_contexts * f_len,
#             fan_out = 1 * num_contexts * f_len, gain = 1).
# ---------------------------------------------------------------------------
def init_position_embeddings(key, num_contexts, d_model, f_len):
    receptive = num_contexts * f_len
    fan_in = d_model * receptive
    fan_out = 1 * receptive
    bound = math.sqrt(6.0 / (fan_in + fan_out))
    return jax.random.uniform(
        key, (1, d_model, num_contexts, f_len), jnp.float32, -bound, bound)


if __name__ == "__main__":
    key = jax.random.PRNGKey(0)

    # Module defaults: num_contexts=4, d_model=32, f_len=24.
    num_contexts, d_model, f_len = 4, 32, 24
    pe = init_position_embeddings(key, num_contexts, d_model, f_len)

    out = symbol_encoding_forward(pe)
    out = jax.block_until_ready(out)

    assert out.shape == (1, d_model, num_contexts, f_len)
    assert jnp.all(jnp.isfinite(out))
    assert jnp.array_equal(out, pe)  # forward() returns the parameter verbatim
    print("KERNEL_OK")
</pallas_src>

<mosaic_0001>
module attributes {stable_mosaic.version = 11 : i64} {
  func.func @_symbol_encoding_kernel(%arg0: memref<1x32x4x24xf32, #tpu.memory_space<any>>, %arg1: memref<1x32x4x24xf32, #tpu.memory_space<any>>, %arg2: memref<!tpu.dma_semaphore, #tpu.memory_space<semaphore_mem>>) attributes {dimension_semantics = [], scalar_prefetch = 0 : i64, scratch_operands = 1 : i64, tpu.core_type = #tpu.core_type<tc>} {
    tpu.enqueue_dma source(%arg0 : memref<1x32x4x24xf32, #tpu.memory_space<any>>) target(%arg1 : memref<1x32x4x24xf32, #tpu.memory_space<any>>) target_semaphore(%arg2 : memref<!tpu.dma_semaphore, #tpu.memory_space<semaphore_mem>>)
    tpu.wait_dma2 semaphore(%arg2 : memref<!tpu.dma_semaphore, #tpu.memory_space<semaphore_mem>>) src(%arg0 : memref<1x32x4x24xf32, #tpu.memory_space<any>>) dst(%arg1 : memref<1x32x4x24xf32, #tpu.memory_space<any>>)
    return
  }
}

</mosaic_0001>

<bundles_post_ra>
// kernel: tpu_custom_call.1
= control target key start
LH: loop header
LB: loop body
LE: loop exit
PB: predicated region body
PF: predicated region fallthrough
CT: control target
= control target key end

     0   :  { %s206_s0 = inlined_call_operand.vmem [shape: f32[1,32,4,24], index: 0, kind: input, shape index: {}]   ;;  %s207_s1 = inlined_call_operand.vmem [shape: f32[1,32,4,24], index: 1, kind: output, shape index: {}]  }
   0x1   :  { %v38_v0 = vld [vmem:[%s206_s0] sm:$0xff]  ;;  %v40_v1 = vld [vmem:[%s206_s0 + $0x8] sm:$0xff]  ;;  %v42_v2 = vld [vmem:[%s206_s0 + $0x10] sm:$0xff] }
   0x2   :  { %39 = vst [vmem:[%s207_s1] sm:$0xff] %v38_v0  ;;  %41 = vst [vmem:[%s207_s1 + $0x8] sm:$0xff] %v40_v1  ;;  %v44_v3 = vld [vmem:[%s206_s0 + $0x18] sm:$0xff]  ;;  %v46_v4 = vld [vmem:[%s206_s0 + $0x20] sm:$0xff] }
   0x3   :  { %43 = vst [vmem:[%s207_s1 + $0x10] sm:$0xff] %v42_v2  ;;  %v48_v5 = vld [vmem:[%s206_s0 + $0x28] sm:$0xff]  ;;  %45 = vst [vmem:[%s207_s1 + $0x18] sm:$0xff] %v44_v3  ;;  %v50_v6 = vld [vmem:[%s206_s0 + $0x30] sm:$0xff] }
   0x4   :  { %47 = vst [vmem:[%s207_s1 + $0x20] sm:$0xff] %v46_v4  ;;  %49 = vst [vmem:[%s207_s1 + $0x28] sm:$0xff] %v48_v5  ;;  %v52_v7 = vld [vmem:[%s206_s0 + $0x38] sm:$0xff]  ;;  %v54_v8 = vld [vmem:[%s206_s0 + $0x40] sm:$0xff] }
   0x5   :  { %51 = vst [vmem:[%s207_s1 + $0x30] sm:$0xff] %v50_v6  ;;  %53 = vst [vmem:[%s207_s1 + $0x38] sm:$0xff] %v52_v7  ;;  %v56_v9 = vld [vmem:[%s206_s0 + $0x48] sm:$0xff]  ;;  %v58_v10 = vld [vmem:[%s206_s0 + $0x50] sm:$0xff] }
   0x6   :  { %55 = vst [vmem:[%s207_s1 + $0x40] sm:$0xff] %v54_v8  ;;  %v60_v11 = vld [vmem:[%s206_s0 + $0x58] sm:$0xff]  ;;  %57 = vst [vmem:[%s207_s1 + $0x48] sm:$0xff] %v56_v9  ;;  %v62_v12 = vld [vmem:[%s206_s0 + $0x60] sm:$0xff] }
   0x7   :  { %59 = vst [vmem:[%s207_s1 + $0x50] sm:$0xff] %v58_v10  ;;  %61 = vst [vmem:[%s207_s1 + $0x58] sm:$0xff] %v60_v11  ;;  %v64_v13 = vld [vmem:[%s206_s0 + $0x68] sm:$0xff]  ;;  %v66_v14 = vld [vmem:[%s206_s0 + $0x70] sm:$0xff] }
   0x8   :  { %63 = vst [vmem:[%s207_s1 + $0x60] sm:$0xff] %v62_v12  ;;  %65 = vst [vmem:[%s207_s1 + $0x68] sm:$0xff] %v64_v13  ;;  %v68_v15 = vld [vmem:[%s206_s0 + $0x78] sm:$0xff] }
   0x9   :  { %67 = vst [vmem:[%s207_s1 + $0x70] sm:$0xff] %v66_v14  ;;  %69 = vst [vmem:[%s207_s1 + $0x78] sm:$0xff] %v68_v15 }
   0xa   :  { %77 = vsyncadd [#allocation2], 2048 }
   0xb   :  { %98 = dma.done.wait [#allocation2], 2048 }
   0xc   :  { %99 = vsyncadd [#allocation2], 4294965248 }
   0xd   :  { %83 = vsyncmov [#allocation2] }
  0x10   :  { %s84_s12 = vpop.sfrf %83 }
  0x11   :  { %p97_p0 = scmp.ne.s32.totalorder %s84_s12, 0 }
  0x13   :  { %88 = shalt.err (%p97_p0)  }

</bundles_post_ra>
